<compile_context>
chip_gen: v5e
topology: v5e:2x2
jax: 0.10.0
libtpu: 0.0.40
codegen_flags: <defaults>
</compile_context>

<pallas_src>
import functools
import math

import jax
import jax.numpy as jnp
from jax import lax
from jax.experimental import pallas as pl
from jax.experimental.pallas import tpu as pltpu


_MATMUL_WEIGHTS = ('wq', 'wk', 'wv', 'wo', 'ffn_w1', 'ffn_w2')
# Feature ladder index for the encoder-block call:
#   0: single-buffered weights + head-batched attention
#   1: double-buffered weights + head-batched attention
#   2: single-buffered weights + per-head fallback
#   3: double-buffered weights + per-head fallback
_BLOCK_OPTIONS = [(True, True), (False, True), (True, False), (False, False)]
_BLOCK_OPTION = 0


# ---------------------------------------------------------------------------
# shared math (used inside the Pallas kernels and in the pure-JAX reference)
# ---------------------------------------------------------------------------
def _layer_norm(x, gamma, beta, eps=1e-5):
    mean = jnp.mean(x, axis=-1, keepdims=True)
    var = jnp.mean(jnp.square(x - mean), axis=-1, keepdims=True)
    return (x - mean) * lax.rsqrt(var + eps) * gamma + beta


def _positional_encoding_table(max_len, num_hiddens):
    pos = jnp.arange(max_len, dtype=jnp.float32)[:, None]
    div = jnp.power(10000.0,
                    jnp.arange(0, num_hiddens, 2, dtype=jnp.float32) / num_hiddens)
    ang = pos / div                                      # (max_len, D/2)
    table = jnp.zeros((max_len, num_hiddens), jnp.float32)
    table = table.at[:, 0::2].set(jnp.sin(ang))
    table = table.at[:, 1::2].set(jnp.cos(ang))
    return table


# ---------------------------------------------------------------------------
# VMEM-budget-aware tiling
# ---------------------------------------------------------------------------
def _vmem_limit_bytes():
    cap = 64 * 1024 * 1024                 # conservative fallback (v7x physical)
    try:
        cap = int(pltpu.get_tpu_info().vmem_capacity_bytes)
    except Exception:
        pass
    return min(int(cap * 3 // 4), 96 * 1024 * 1024)


def _estimate_block_vmem(bt, seq, dim, ffn_dim, num_heads, weight_bytes,
                         weight_bufs=2):
    f32 = 4
    act = 2 * 2 * bt * seq * dim * f32                       # x in + out, dbl-buffered
    weights = weight_bufs * (4 * dim * dim + 2 * dim * ffn_dim) * weight_bytes
    small = weight_bufs * (5 * dim + ffn_dim) * f32          # LN params + biases
    live = (4 * bt * seq * dim                                # q, k, v, ctx
            + 2 * bt * num_heads * seq * seq                  # scores + probs
            + bt * seq * ffn_dim) * f32                       # FFN hidden
    return act + weights + small + live + live // 2           # ~1.5x fudge on live


def _pick_batch_tile(batch, seq, dim, ffn_dim, num_heads, weight_bytes, budget):
    for bt in range(batch, 0, -1):
        if batch % bt:
            continue
        if batch >= 2 and batch // bt < 2:
            continue      # keep >= 2 grid steps so both v7x TensorCores get work
        if _estimate_block_vmem(bt, seq, dim, ffn_dim, num_heads,
                                weight_bytes) <= budget:
            return bt
    return 1


# ---------------------------------------------------------------------------
# Kernel 1: embedding * sqrt(D) + positional encoding
# ---------------------------------------------------------------------------
def _embed_pos_kernel(ids_ref, emb_ref, pos_ref, o_ref, *, scale):
    bt, seq, _ = ids_ref.shape
    vocab, dim = emb_ref.shape
    ids = ids_ref[...].reshape(bt * seq, 1)
    vocab_iota = lax.broadcasted_iota(jnp.int32, (bt * seq, vocab), 1)
    # Exact one-hot matmul lookup (fine for small vocabs, stays on the MXU).
    # TODO(synk): large-vocab embedding should use a scalar-prefetch DMA gather
    #             (emb in pl.ANY/HBM) instead of holding the table in VMEM.
    one_hot = (vocab_iota == ids).astype(jnp.float32)
    x = jnp.dot(one_hot, emb_ref[...], preferred_element_type=jnp.float32) * scale
    x = x.reshape(bt, seq, dim) + pos_ref[...][None, :, :]
    # TODO(synk): PositionalEncoding dropout is identity in eval mode.
    o_ref[...] = x.astype(o_ref.dtype)


def _embed_pos(tokens, emb, pos, scale, bt, vmem_limit):
    batch, seq = tokens.shape
    vocab, dim = emb.shape
    ids3 = tokens.astype(jnp.int32).reshape(batch, seq, 1)
    return pl.pallas_call(
        functools.partial(_embed_pos_kernel, scale=scale),
        out_shape=jax.ShapeDtypeStruct((batch, seq, dim), jnp.float32),
        grid=(batch // bt,),
        in_specs=[
            pl.BlockSpec((bt, seq, 1), lambda i: (i, 0, 0)),
            pl.BlockSpec((vocab, dim), lambda i: (0, 0)),
            pl.BlockSpec((seq, dim), lambda i: (0, 0)),
        ],
        out_specs=pl.BlockSpec((bt, seq, dim), lambda i: (i, 0, 0)),
        compiler_params=pltpu.CompilerParams(
            dimension_semantics=("parallel",),
            vmem_limit_bytes=vmem_limit),
    )(ids3, emb, pos)


# ---------------------------------------------------------------------------
# Kernel 2: one full Transformer encoder block (MHA + AddNorm + FFN + AddNorm)
# ---------------------------------------------------------------------------
def _encoder_block_kernel(vl_ref, x_ref,
                          wq_ref, wk_ref, wv_ref, wo_ref,
                          g1_ref, b1_ref, w1_ref, fb1_ref,
                          w2_ref, fb2_ref, g2_ref, b2_ref,
                          o_ref, *, num_heads, compute_dtype, head_batched):
    bt, seq, dim = x_ref.shape
    hd = dim // num_heads
    inv_sqrt_d = 1.0 / math.sqrt(hd)
    exact = jnp.dtype(compute_dtype) == jnp.dtype(jnp.float32)

    x = x_ref[...].astype(jnp.float32)
    xf = x.reshape(bt * seq, dim)                       # fold (batch, seq) into M
    xc = xf.astype(compute_dtype)

    # QKV projections (no bias; use_bias=False in the module). bf16 operands,
    # f32 accumulation.
    q = jnp.dot(xc, wq_ref[...], preferred_element_type=jnp.float32)
    k = jnp.dot(xc, wk_ref[...], preferred_element_type=jnp.float32)
    v = jnp.dot(xc, wv_ref[...], preferred_element_type=jnp.float32)

    base = pl.program_id(0) * bt

    def batch_vlen(rows, rep):
        # (rows,1,1) int32 tensor holding the valid_len of each (batch,head) row.
        bidx = lax.broadcasted_iota(jnp.int32, (rows, 1, 1), 0) // rep
        vlen = jnp.zeros((rows, 1, 1), jnp.int32)
        for b in range(bt):                              # bt is a small constant
            vlen = jnp.where(bidx == b, vl_ref[base + b], vlen)
        return vlen

    def masked_softmax3(s, vlen):
        key_pos = lax.broadcasted_iota(jnp.int32, s.shape, 2)
        s = jnp.where(key_pos < vlen, s, jnp.float32(-1e6))
        m = jnp.max(s, axis=-1, keepdims=True)
        e = jnp.exp(s - m)
        denom = jnp.sum(e, axis=-1, keepdims=True)
        if exact:
            return e / denom
        return e * pl.reciprocal(denom, approx=True)     # EUP slot, VALU-free
        # TODO(synk): attention-weight dropout is identity in eval mode.

    if head_batched:
        # Head-batched attention: fold heads into the leading batch dim and do
        # the score / context matmuls as single 3D batched einsums.
        def to_heads(t):
            return (t.reshape(bt, seq, num_heads, hd)
                     .transpose(0, 2, 1, 3)
                     .reshape(bt * num_heads, seq, hd)
                     .astype(compute_dtype))
        qh, kh, vh = to_heads(q), to_heads(k), to_heads(v)
        s = jnp.einsum('bqd,bkd->bqk', qh, kh,
                       preferred_element_type=jnp.float32) * inv_sqrt_d
        attn = masked_softmax3(s, batch_vlen(bt * num_heads, num_heads))
        ctx = jnp.einsum('bqk,bkd->bqd', attn.astype(compute_dtype), vh,
                         preferred_element_type=jnp.float32)
        attn_cat = (ctx.reshape(bt, num_heads, seq, hd)
                       .transpose(0, 2, 1, 3)
                       .reshape(bt * seq, dim))
    else:
        # Fallback: per-head loop (still vectorized mask + bf16 + reciprocal).
        vlen = batch_vlen(bt, 1)
        head_outs = []
        for h in range(num_heads):
            sl = slice(h * hd, (h + 1) * hd)
            qh = q[:, sl].reshape(bt, seq, hd).astype(compute_dtype)
            kh = k[:, sl].reshape(bt, seq, hd).astype(compute_dtype)
            vh = v[:, sl].reshape(bt, seq, hd).astype(compute_dtype)
            s = jnp.einsum('bqd,bkd->bqk', qh, kh,
                           preferred_element_type=jnp.float32) * inv_sqrt_d
            attn = masked_softmax3(s, vlen)
            head_outs.append(jnp.einsum('bqk,bkd->bqd',
                                        attn.astype(compute_dtype), vh,
                                        preferred_element_type=jnp.float32))
        attn_cat = jnp.concatenate(head_outs, axis=-1).reshape(bt * seq, dim)

    attn_out = jnp.dot(attn_cat.astype(compute_dtype), wo_ref[...],
                       preferred_element_type=jnp.float32)

    # AddNorm 1 (f32)
    y = _layer_norm(attn_out + xf, g1_ref[...], b1_ref[...])

    # Position-wise FFN (LazyLinear defaults: bias=True)
    h1 = jnp.maximum(
        jnp.dot(y.astype(compute_dtype), w1_ref[...],
                preferred_element_type=jnp.float32) + fb1_ref[...], 0.0)
    f = jnp.dot(h1.astype(compute_dtype), w2_ref[...],
                preferred_element_type=jnp.float32) + fb2_ref[...]

    # AddNorm 2 (f32)
    z = _layer_norm(f + y, g2_ref[...], b2_ref[...])
    o_ref[...] = z.reshape(bt, seq, dim).astype(o_ref.dtype)


def _make_block_call(batch, seq, dim, ffn_dim, num_heads, bt, compute_dtype,
                     single_buffer_weights, head_batched, vmem_limit):
    def data_map(i, vl):              # prefetch ref passed positionally, unused
        return (i, 0, 0)

    def const_map(i, vl):
        return (0, 0)

    def wspec(shape):
        if single_buffer_weights:
            # Constant index_map -> no need to double-buffer the weights.
            return pl.BlockSpec(shape, const_map, pipeline_mode=pl.Buffered(1))
        return pl.BlockSpec(shape, const_map)

    grid_spec = pltpu.PrefetchScalarGridSpec(
        num_scalar_prefetch=1,                    # valid_lens -> SMEM
        grid=(batch // bt,),
        in_specs=[
            pl.BlockSpec((bt, seq, dim), data_map),     # x
            wspec((dim, dim)),                          # W_q
            wspec((dim, dim)),                          # W_k
            wspec((dim, dim)),                          # W_v
            wspec((dim, dim)),                          # W_o
            wspec((1, dim)),                            # LN1 gamma
            wspec((1, dim)),                            # LN1 beta
            wspec((dim, ffn_dim)),                      # FFN W1
            wspec((1, ffn_dim)),                        # FFN b1
            wspec((ffn_dim, dim)),                      # FFN W2
            wspec((1, dim)),                            # FFN b2
            wspec((1, dim)),                            # LN2 gamma
            wspec((1, dim)),                            # LN2 beta
        ],
        out_specs=pl.BlockSpec((bt, seq, dim), data_map),
    )
    return pl.pallas_call(
        functools.partial(_encoder_block_kernel, num_heads=num_heads,
                          compute_dtype=compute_dtype,
                          head_batched=head_batched),
        out_shape=jax.ShapeDtypeStruct((batch, seq, dim), jnp.float32),
        grid_spec=grid_spec,
        compiler_params=pltpu.CompilerParams(
            dimension_semantics=("parallel",),
            vmem_limit_bytes=vmem_limit),
    )


def _encoder_block(x, vl, blk, num_heads, bt, compute_dtype, vmem_limit):
    global _BLOCK_OPTION
    batch, seq, dim = x.shape
    ffn_dim = blk['ffn_w1'].shape[1]
    assert batch % bt == 0

    w = {k: (v.astype(compute_dtype) if k in _MATMUL_WEIGHTS else v)
         for k, v in blk.items()}
    args = (vl, x,
            w['wq'], w['wk'], w['wv'], w['wo'],
            w['ln1_g'], w['ln1_b'],
            w['ffn_w1'], w['ffn_b1'], w['ffn_w2'], w['ffn_b2'],
            w['ln2_g'], w['ln2_b'])

    last_err = None
    for idx in range(_BLOCK_OPTION, len(_BLOCK_OPTIONS)):
        single_buf, head_batched = _BLOCK_OPTIONS[idx]
        try:
            out = _make_block_call(batch, seq, dim, ffn_dim, num_heads, bt,
                                   compute_dtype, single_buf, head_batched,
                                   vmem_limit)(*args)
            _BLOCK_OPTION = idx            # remember the first variant that works
            return out
        except Exception as e:             # e.g. Buffered(1)/reshape unsupported
            last_err = e
    raise last_err


def transformer_encoder_forward(tokens, valid_lens, params, num_heads,
                                compute_dtype=jnp.bfloat16, batch_tile=None):
    batch, seq = tokens.shape
    dim = params['emb'].shape[1]
    ffn_dim = params['blocks'][0]['ffn_w1'].shape[1]
    vmem_limit = _vmem_limit_bytes()
    bt = batch_tile or _pick_batch_tile(
        batch, seq, dim, ffn_dim, num_heads,
        jnp.dtype(compute_dtype).itemsize, int(vmem_limit * 0.8))

    x = _embed_pos(tokens, params['emb'], params['pos'][:seq, :],
                   float(math.sqrt(dim)), bt, vmem_limit)

    if valid_lens is None:
        vl = jnp.full((batch,), seq, dtype=jnp.int32)
    else:
        # TODO(synk): per-query (batch, seq)-shaped valid_lens not wired up here.
        vl = valid_lens.astype(jnp.int32)

    for blk in params['blocks']:
        x = _encoder_block(x, vl, blk, num_heads, bt, compute_dtype, vmem_limit)
    # TODO(synk): per-block attention_weights attribute is not materialized.
    return x


# ---------------------------------------------------------------------------
# Pure-JAX reference mirroring the PyTorch module in eval mode
# ---------------------------------------------------------------------------
def _encoder_block_ref(x, vl, blk, num_heads):
    batch, seq, dim = x.shape
    head_dim = dim // num_heads

    def split(t):
        return t.reshape(batch, seq, num_heads, head_dim).transpose(0, 2, 1, 3)

    q, k, v = (split(x @ blk[w]) for w in ('wq', 'wk', 'wv'))
    scores = jnp.einsum('bhqd,bhkd->bhqk', q, k) / math.sqrt(head_dim)
    keep = jnp.arange(seq)[None, None, None, :] < vl[:, None, None, None]
    scores = jnp.where(keep, scores, -1e6)
    attn = jax.nn.softmax(scores, axis=-1)
    out = jnp.einsum('bhqk,bhkd->bhqd', attn, v)
    out = out.transpose(0, 2, 1, 3).reshape(batch, seq, dim) @ blk['wo']
    y = _layer_norm(out + x, blk['ln1_g'], blk['ln1_b'])
    f = (jnp.maximum(y @ blk['ffn_w1'] + blk['ffn_b1'], 0.0)
         @ blk['ffn_w2'] + blk['ffn_b2'])
    return _layer_norm(f + y, blk['ln2_g'], blk['ln2_b'])


def transformer_encoder_ref(tokens, valid_lens, params, num_heads):
    dim = params['emb'].shape[1]
    batch, seq = tokens.shape
    x = params['emb'][tokens] * math.sqrt(dim)
    x = x + params['pos'][None, :seq, :]
    if valid_lens is None:
        vl = jnp.full((batch,), seq, dtype=jnp.int32)
    else:
        vl = valid_lens.astype(jnp.int32)
    for blk in params['blocks']:
        x = _encoder_block_ref(x, vl, blk, num_heads)
    return x


# ---------------------------------------------------------------------------
# Parameters (nn.Linear-style init, weights stored pre-transposed: (in, out))
# ---------------------------------------------------------------------------
def init_params(key, vocab_size, num_hiddens, ffn_num_hiddens, num_blks,
                max_len=64):
    dim, ffn = num_hiddens, ffn_num_hiddens
    k_emb, *blk_keys = jax.random.split(key, num_blks + 1)

    def linear(k, fan_in, shape):
        bound = 1.0 / math.sqrt(fan_in)
        return jax.random.uniform(k, shape, jnp.float32, -bound, bound)

    blocks = []
    for kb in blk_keys:
        ks = jax.random.split(kb, 12)
        blocks.append(dict(
            wq=linear(ks[0], dim, (dim, dim)),
            wk=linear(ks[1], dim, (dim, dim)),
            wv=linear(ks[2], dim, (dim, dim)),
            wo=linear(ks[3], dim, (dim, dim)),
            ln1_g=1.0 + 0.1 * jax.random.normal(ks[4], (1, dim), jnp.float32),
            ln1_b=0.1 * jax.random.normal(ks[5], (1, dim), jnp.float32),
            ffn_w1=linear(ks[6], dim, (dim, ffn)),
            ffn_b1=linear(ks[7], dim, (1, ffn)),
            ffn_w2=linear(ks[8], ffn, (ffn, dim)),
            ffn_b2=linear(ks[9], ffn, (1, dim)),
            ln2_g=1.0 + 0.1 * jax.random.normal(ks[10], (1, dim), jnp.float32),
            ln2_b=0.1 * jax.random.normal(ks[11], (1, dim), jnp.float32),
        ))
    return dict(
        emb=jax.random.normal(k_emb, (vocab_size, dim), jnp.float32),
        pos=_positional_encoding_table(max_len, dim),
        blocks=blocks,
    )


if __name__ == "__main__":
    vocab_size, num_hiddens, ffn_num_hiddens = 50, 32, 64
    num_heads, num_blks = 4, 2
    batch, seq = 2, 8

    root = jax.random.PRNGKey(0)
    k_params, k_tok = jax.random.split(root)
    params = init_params(k_params, vocab_size, num_hiddens, ffn_num_hiddens,
                         num_blks)
    tokens = jax.random.randint(k_tok, (batch, seq), 0, vocab_size,
                                dtype=jnp.int32)
    valid_lens = jnp.array([3, 6], dtype=jnp.int32)

    # Reference + exact-math (f32) kernel check under full matmul precision.
    with jax.default_matmul_precision("highest"):
        ref = jax.block_until_ready(
            transformer_encoder_ref(tokens, valid_lens, params, num_heads))
        out_f32 = jax.block_until_ready(
            transformer_encoder_forward(tokens, valid_lens, params, num_heads,
                                        compute_dtype=jnp.float32))

    # Production path: bf16 MXU operands, f32 accumulation, default precision.
    out_bf16 = jax.block_until_ready(
        transformer_encoder_forward(tokens, valid_lens, params, num_heads,
                                    compute_dtype=jnp.bfloat16))

    assert out_f32.shape == (batch, seq, num_hiddens)
    assert out_bf16.shape == (batch, seq, num_hiddens)
    err32 = float(jnp.max(jnp.abs(out_f32 - ref)))
    err16 = float(jnp.max(jnp.abs(out_bf16 - ref)))
    assert jnp.allclose(out_f32, ref, rtol=2e-3, atol=2e-3), \
        f"f32 max |err| = {err32}"
    assert jnp.allclose(out_bf16, ref, rtol=5e-2, atol=5e-2), \
        f"bf16 max |err| = {err16}"
    print("KERNEL_OK")
</pallas_src>

<mosaic_0001>
module attributes {stable_mosaic.version = 11 : i64} {
  func.func @_embed_pos_kernel(%arg0: i32, %arg1: memref<1x8x1xi32, #tpu.memory_space<vmem>>, %arg2: memref<50x32xf32, #tpu.memory_space<vmem>>, %arg3: memref<8x32xf32, #tpu.memory_space<vmem>>, %arg4: memref<1x8x32xf32, #tpu.memory_space<vmem>>) attributes {dimension_semantics = [#tpu.dimension_semantics<parallel>], iteration_bounds = array<i64: 2>, scalar_prefetch = 0 : i64, scratch_operands = 0 : i64, tpu.core_type = #tpu.core_type<tc>, window_params = [{transform_indices = @transform_0, window_bounds = array<i64: 1, 8, 1>}, {pipeline_mode = #tpu.pipeline_mode<synchronous>, transform_indices = @transform_1, window_bounds = array<i64: 50, 32>}, {pipeline_mode = #tpu.pipeline_mode<synchronous>, transform_indices = @transform_2, window_bounds = array<i64: 8, 32>}, {transform_indices = @transform_3, window_bounds = array<i64: 1, 8, 32>}]} {
    %c0 = arith.constant 0 : index
    %c0_0 = arith.constant 0 : index
    %c0_1 = arith.constant 0 : index
    %0 = vector.load %arg1[%c0, %c0_0, %c0_1] : memref<1x8x1xi32, #tpu.memory_space<vmem>>, vector<1x8x1xi32>
    %1 = vector.shape_cast %0 : vector<1x8x1xi32> to vector<8x1xi32>
    %2 = tpu.iota {dimensions = array<i32: 1>} : vector<8x50xi32>
    %3 = vector.broadcast %1 : vector<8x1xi32> to vector<8x50xi32>
    %4 = arith.cmpi eq, %2, %3 : vector<8x50xi32>
    %5 = arith.extui %4 : vector<8x50xi1> to vector<8x50xi32>
    %6 = arith.sitofp %5 : vector<8x50xi32> to vector<8x50xf32>
    %c0_2 = arith.constant 0 : index
    %c0_3 = arith.constant 0 : index
    %7 = vector.load %arg2[%c0_2, %c0_3] : memref<50x32xf32, #tpu.memory_space<vmem>>, vector<50x32xf32>
    %cst = arith.constant dense<0.000000e+00> : vector<8x32xf32>
    %8 = tpu.matmul %6, %7, %cst {dimension_numbers = #tpu.dot_dimension_numbers<[1], [0], [0], [1], [0, 0, 1, 1], [], []>, precision = #tpu.contract_precision<fp32>} : vector<8x50xf32>, vector<50x32xf32>, vector<8x32xf32> -> vector<8x32xf32>
    %cst_4 = arith.constant 5.65685415 : f32
    %9 = vector.broadcast %cst_4 : f32 to vector<8x32xf32>
    %10 = arith.mulf %8, %9 : vector<8x32xf32>
    %11 = vector.shape_cast %10 : vector<8x32xf32> to vector<1x8x32xf32>
    %c0_5 = arith.constant 0 : index
    %c0_6 = arith.constant 0 : index
    %12 = vector.load %arg3[%c0_5, %c0_6] : memref<8x32xf32, #tpu.memory_space<vmem>>, vector<8x32xf32>
    %13 = vector.shape_cast %12 : vector<8x32xf32> to vector<1x8x32xf32>
    %14 = arith.addf %11, %13 : vector<1x8x32xf32>
    %c0_7 = arith.constant 0 : index
    %c0_8 = arith.constant 0 : index
    %c0_9 = arith.constant 0 : index
    %15 = vector.load %arg4[%c0_7, %c0_8, %c0_9] : memref<1x8x32xf32, #tpu.memory_space<vmem>>, vector<1x8x32xf32>
    tpu.vector_store %arg4[%c0_7, %c0_8, %c0_9], %14 {strides = array<i32>} : memref<1x8x32xf32, #tpu.memory_space<vmem>>, vector<1x8x32xf32>,
    return
  }
  func.func @transform_0(%arg0: i32) -> (i32, i32, i32) {
    %c0_i32 = arith.constant 0 : i32
    %c0_i32_0 = arith.constant 0 : i32
    %c0_i32_1 = arith.constant 0 : i32
    return %arg0, %c0_i32, %c0_i32_0 : i32, i32, i32
  }
  func.func @transform_1(%arg0: i32) -> (i32, i32) {
    %c0_i32 = arith.constant 0 : i32
    %c0_i32_0 = arith.constant 0 : i32
    %c0_i32_1 = arith.constant 0 : i32
    return %c0_i32, %c0_i32_0 : i32, i32
  }
  func.func @transform_2(%arg0: i32) -> (i32, i32) {
    %c0_i32 = arith.constant 0 : i32
    %c0_i32_0 = arith.constant 0 : i32
    %c0_i32_1 = arith.constant 0 : i32
    return %c0_i32, %c0_i32_0 : i32, i32
  }
  func.func @transform_3(%arg0: i32) -> (i32, i32, i32) {
    %c0_i32 = arith.constant 0 : i32
    %c0_i32_0 = arith.constant 0 : i32
    %c0_i32_1 = arith.constant 0 : i32
    return %arg0, %c0_i32, %c0_i32_0 : i32, i32, i32
  }
}

</mosaic_0001>

<bundles_post_ra>
// kernel: tpu_custom_call.1
= control target key start
LH: loop header
LB: loop body
LE: loop exit
PB: predicated region body
PF: predicated region fallthrough
CT: control target
= control target key end

     0   :  { %8 = vsyncpa [#allocation3], 0  ;;  %s787_s0 = inlined_call_operand.vmem [shape: s32[2,8,1], index: 0, kind: input, shape index: {}]   ;;  %s788_s1 = inlined_call_operand.vmem [shape: f32[50,32], index: 1, kind: input, shape index: {}]   ;;  %s789_s2 = inlined_call_operand.vmem [shape: f32[8,32], index: 2, kind: input, shape index: {}]   ;;  %s790_s3 = inlined_call_operand.hbm [shape: f32[2,8,32], index: 3, kind: output, shape index: {}]  }
   0x1   :  { %10 = vsyncpa [#allocation3 + $0x1], 0  ;;  %s636_s12 = smov 0   ;;  %s638_s13 = smov 0  }
   0x2   :  { %s640_s14 = smov 0   ;;  %s642_s15 = smov 0  }
   0x3 LB: > { %s657_s16 = sadd.s32 4294967295, %s612_s15   ;;  %s494_s17 = sadd.s32 4294967294, %s612_s15   ;;  %s612_s15 = sphi %s642_s15, %s796_s15   ;;  %s608_s14 = sphi %s640_s14, %s795_s14   ;;  %s604_s13 = sphi %s638_s13, %s794_s13   ;;  %s600_s12 = sphi %s636_s12, %s793_s12  }
   0x4   : > { %s661_s18 = sadd.s32 1, %s612_s15   ;;  %s91_s19 = sadd.s32 1, %s608_s14 }
   0x5   : > { %s88_s20 = ssub.s32 %s612_s15, %s661_s18  ;;  %p101_p0 = scmp.ne.s32.totalorder %s608_s14, %s604_s13 }
   0x6   : > { %p89_p1 = scmp.eq.s32.totalorder %s88_s20, 0  ;;  %p102_p2 = scmp.eq.s32.totalorder %s657_s16, 1 }
   0x7   : > { %p107_p3 = scmp.ne.s32.totalorder %s604_s13, %s600_s12  ;;  %p108_p4 = scmp.eq.s32.totalorder %s494_s17, 1 }
   0x8   : > { %s672_s21 = scalar_select %p89_p1, %s608_s14, %s91_s19  }
   0x9   : > { %p674_p5 = por %p102_p2, %p101_p0  ;;  %p678_p6 = por %p108_p4, %p107_p3 }
   0xa   : > { %p497_p7 = scmp.ge.s32.totalorder %s612_s15, 1  ;;  %p139_p8 = scmp.lt.s32.totalorder %s612_s15, 3 }
   0xc   : > { %p140_p9 = pnand %p497_p7, %p139_p8 }
   0xd   : > { %p162_p10 = scmp.lt.s32.totalorder (!%p140_p9), %s657_s16, 1  ;;  %s159_s25 = sand.u32 (!%p140_p9), 1, %s604_s13  }
   0xe   : > { %143 = sbr.rel (%p140_p9) target bundleno = 297 (0x129), region = 32  ;;  %s498_s26 = sshll.u32 (!%p140_p9), %s159_s25, 3 }
   0xf   : > { %s505_s27 = sshll.u32 (!%p140_p9), %s657_s16, 3  ;;  %s161_s6 = scalar_lea.vmem (!%p140_p9), [#allocation2], %s498_s26 }
  0x10   : > { %s430_s30 = scalar_lea.hbm (!%p140_p9), %s790_s3, %s505_s27  ;;  %s570_s19 = scalar_lea.hbm (!%p140_p9), %s790_s3, 16 }
  0x11   : > { %s434_s8 = sshll.u32 (!%p140_p9), %s430_s30, 4  ;;  %s435_s8 = int_to_ptr.hbm [resolvable:$true] %s434_s8 }
  0x12   : > { %s564_s9 = sshra.s32 (!%p140_p9), %s435_s8, 4  ;;  %s565_s9 = int_to_ptr.hbm [resolvable:$true] %s564_s9 }
  0x13   : > { %v181_v0 = vld [vmem:[%s788_s1 + $0x30] sm:$0x3]  ;;  %vm186_vm0 = vcmask 1041408   ;;  %v180_v1 = vld [vmem:[%s788_s1 + $0x28] sm:$0xff]  ;;  %v614_v2 = vmov 0   ;;  %v179_v5 = vld [vmem:[%s788_s1 + $0x20] sm:$0xff]  ;;  %v167_v45 = vlaneseq  ;;  %p571_p0 = scmp.lt.s32.totalorder %s565_s9, %s790_s3 }
  0x14   : > { %549 = vset.pattern.permute.xlu0 %v614_v2  ;;  %v188_v3 = vsel %vm186_vm0, %v181_v0, 0  ;;  %v691_v4 = vand.u32 4294901760, %v180_v1  ;;  %v178_v6 = vld [vmem:[%s788_s1 + $0x18] sm:$0xff]  ;;  %v177_v7 = vld [vmem:[%s788_s1 + $0x10] sm:$0xff]  ;;  %s163_s7 = scalar_select %p162_p10, %s657_s16, 1  ;;  %v705_v9 = vand.u32 4294901760, %v179_v5 }
  0x15   : > { %v703_v8 = vand.u32 4294901760, %v188_v3  ;;  %v707_v10 = vand.u32 4294901760, %v178_v6  ;;  %v709_v11 = vand.u32 4294901760, %v177_v7  ;;  %v176_v12 = vld [vmem:[%s788_s1 + $0x8] sm:$0xff]  ;;  %v175_v15 = vld [vmem:[%s788_s1] sm:$0xff]  ;;  %v168_v46 = vand.u32 127, %v167_v45 }
  0x16   : > { %v238_v13 = vsub.f32 %v180_v1, %v691_v4  ;;  %v715_v14 = vand.u32 4294901760, %v176_v12  ;;  %s499_s17 = sshll.u32 %s163_s7, 3  ;;  %v244_v17 = vsub.f32 %v179_v5, %v705_v9  ;;  %v729_v21 = vand.u32 4294901760, %v175_v15  ;;  %v415_v2 = vld [vmem:[%s789_s2] sm:$0xff]  ;;  %s432_s7 = sshll.u32 %s161_s6, 4  ;;  %s433_s7 = int_to_ptr.vmem [resolvable:$true] %s432_s7 }
  0x17   : > { %v232_v16 = vsub.f32 %v188_v3, %v703_v8  ;;  %v250_v18 = vsub.f32 %v178_v6, %v707_v10  ;;  %v256_v19 = vsub.f32 %v177_v7, %v709_v11  ;;  %200 = vmatpush.msra.mxu0 %v703_v8  ;;  %s165_s24 = scalar_lea.vmem %s787_s0, %s499_s17  ;;  %324 = vmatpush.msra.mxu3 %v703_v8  ;;  %vm182_vm1 = vcmask 408576   ;;  %s420_s16 = scalar_lea.sflag [#allocation3], %s159_s25 }
  0x18   : > { %v239_v20 = vand.u32 4294901760, %v238_v13  ;;  %v166_v22 = vld [vmem:[%s165_s24] sm:$0xff]  ;;  %v245_v24 = vand.u32 4294901760, %v244_v17  ;;  %v262_v26 = vsub.f32 %v176_v12, %v715_v14  ;;  %v268_v31 = vsub.f32 %v175_v15, %v729_v21  ;;  %s566_s10 = scalar_lea.hbm %s565_s9, 8 }
  0x19   : > { %v233_v23 = vand.u32 4294901760, %v232_v16  ;;  %v251_v25 = vand.u32 4294901760, %v250_v18  ;;  %289 = vmatpush.msra.mxu2 %v232_v16  ;;  %202 = vmatpush.msra.mxu0 %v691_v4  ;;  %v257_v30 = vand.u32 4294901760, %v256_v19  ;;  %v615_v48 = vmov 0.0   ;;  %p567_p11 = scmp.ne.s32.totalorder %s565_s9, %s566_s10  ;;  %p572_p1 = scmp.lt.s32.totalorder %s570_s19, %s566_s10 }
  0x1a   : > { %170 = vperm.xlu0 %549, %v166_v22   ;;  %v240_v27 = vsub.f32 %v238_v13, %v239_v20  ;;  %326 = vmatpush.msra.mxu3 %v691_v4  ;;  %v246_v29 = vsub.f32 %v244_v17, %v245_v24  ;;  %v263_v35 = vand.u32 4294901760, %v262_v26  ;;  %v269_v38 = vand.u32 4294901760, %v268_v31 }
  0x1b   : > { %v234_v28 = vsub.f32 %v232_v16, %v233_v23  ;;  %292 = vmatpush.msra.mxu2 %v238_v13  ;;  %204 = vmatpush.msra.mxu0 %v705_v9  ;;  %v252_v34 = vsub.f32 %v250_v18, %v251_v25  ;;  %v258_v37 = vsub.f32 %v256_v19, %v257_v30  ;;  %vm417_vm3 = vcmask 261120   ;;  %p568_p12 = pnand %p567_p11, %p674_p5  ;;  %p573_p2 = por %p572_p1, %p571_p0 }
  0x1c   : > { %328 = vmatpush.msra.mxu3 %v705_v9  ;;  %v241_v33 = vand.u32 4294901760, %v240_v27  ;;  %v247_v36 = vand.u32 4294901760, %v246_v29  ;;  %v264_v40 = vsub.f32 %v262_v26, %v263_v35  ;;  %v270_v42 = vsub.f32 %v268_v31, %v269_v38 }
  0x1d   : > { %v235_v32 = vand.u32 4294901760, %v234_v28  ;;  %295 = vmatpush.msra.mxu2 %v244_v17  ;;  %206 = vmatpush.msra.mxu0 %v707_v10  ;;  %v253_v39 = vand.u32 4294901760, %v252_v34  ;;  %v259_v41 = vand.u32 4294901760, %v258_v37  ;;  %p569_p13 = pneg %p568_p12 }
  0x1e   : > { %330 = vmatpush.msra.mxu3 %v707_v10  ;;  %v265_v43 = vand.u32 4294901760, %v264_v40  ;;  %v271_v44 = vand.u32 4294901760, %v270_v42 }
  0x1f   : > { %236 = vmatpush.msra.mxu1 %v235_v32  ;;  %298 = vmatpush.msra.mxu2 %v250_v18  ;;  %p574_p3 = pnand %p573_p2, %p569_p13 }
  0x20   : > { %208 = vmatpush.msra.mxu0 %v709_v11  ;;  %332 = vmatpush.msra.mxu3 %v709_v11 }
  0x21   : > { %242 = vmatpush.msra.mxu1 %v241_v33  ;;  %301 = vmatpush.msra.mxu2 %v256_v19 }
  0x22   : > { %210 = vmatpush.msra.mxu0 %v715_v14  ;;  %334 = vmatpush.msra.mxu3 %v715_v14 }
  0x23   : > { %248 = vmatpush.msra.mxu1 %v247_v36  ;;  %304 = vmatpush.msra.mxu2 %v262_v26 }
  0x24   : > { %212 = vmatpush.msra.mxu0 %v729_v21  ;;  %336 = vmatpush.msra.mxu3 %v729_v21 }
  0x25   : > { %254 = vmatpush.msra.mxu1 %v253_v39  ;;  %307 = vmatpush.msra.mxu2 %v268_v31 }
  0x26   : > { %356 = vmatpush.msrb.mxu0 %v233_v23 }
  0x27   : > { %260 = vmatpush.msra.mxu1 %v259_v41 }
  0x28   : > { %360 = vmatpush.msrb.mxu0 %v239_v20 }
  0x29   : > { %266 = vmatpush.msra.mxu1 %v265_v43 }
  0x2a   : > { %364 = vmatpush.msrb.mxu0 %v245_v24 }
  0x2b   : > { %272 = vmatpush.msra.mxu1 %v271_v44 }
  0x2c   : > { %368 = vmatpush.msrb.mxu0 %v251_v25 }
  0x2d   : > { %396 = vmatpush.msrb.mxu1 %v703_v8 }
  0x2e   : > { %372 = vmatpush.msrb.mxu0 %v257_v30 }
  0x2f   : > { %398 = vmatpush.msrb.mxu1 %v691_v4 }
  0x30   : > { %376 = vmatpush.msrb.mxu0 %v263_v35 }
  0x31   : > { %400 = vmatpush.msrb.mxu1 %v705_v9 }
  0x32   : > { %380 = vmatpush.msrb.mxu0 %v269_v38 }
  0x33   : > { %402 = vmatpush.msrb.mxu1 %v707_v10 }
  0x35   : > { %404 = vmatpush.msrb.mxu1 %v709_v11 }
  0x37   : > { %406 = vmatpush.msrb.mxu1 %v715_v14 }
  0x39   : > { %408 = vmatpush.msrb.mxu1 %v729_v21 }
  0x8c   : > { %v171_v47 = vpop.permute.xlu0 %170 }
  0x8d   : > { %vm172_vm2 = vcmp.eq.s32.totalorder %v168_v46, %v171_v47 }
  0x8e   : > { %v500_v49 = vsel %vm172_vm2, 1.0, %v615_v48 }
  0x8f   : > { %501 = vmatmul.msk.f32.vlgmr.msra.gmra.mxu1 %vm182_vm1, %v500_v49  ;;  %v184_v50 = vsel %vm182_vm1, %v500_v49, 0 }
  0x90   : > { %v214_v51 = vsub.f32 %v184_v50, %v184_v50 }
  0x92   : > { %310 = vmatmul.f32.vlgmr.msra.gmra.mxu2 %v214_v51  ;;  %v215_v52 = vand.u32 4294901760, %v214_v51 }
  0x94   : > { %340 = vmatmul.f32.vlgmr.msra.gmra.mxu3 %v215_v52  ;;  %v216_v53 = vsub.f32 %v214_v51, %v215_v52 }
  0x96   : > { %v217_v54 = vand.u32 4294901760, %v216_v53 }
  0x97   : > { %503 = vmatmul.msk.f32.vlgmr.msrb.gmra.mxu1 %vm182_vm1, %v500_v49 }
  0x98   : > { %218 = vmatmul.f32.vlgmr.msra.gmra.mxu0 %v217_v54 }
  0xa0   : > { %502 = vmatmul.msk.f32.vlgmr.msrb.gmra.mxu0 %vm182_vm1, %v500_v49 }
 0x10c   : > { %v275_v55 = vpop.f32.mrf.mxu1 }
 0x114   : > { %v411_v0 = vpop.f32.mrf.mxu1 }
 0x115   : > { %v219_v56 = vpop.f32.mrf.mxu0  ;;  %v311_v58 = vpop.f32.mrf.mxu2 }
 0x116   : > { %v276_v57 = vadd.f32 %v275_v55, %v219_v56 }
 0x117   : > { %v341_v60 = vpop.f32.mrf.mxu3 }
 0x118   : > { %v312_v59 = vadd.f32 %v311_v58, %v276_v57 }
 0x11a   : > { %v342_v61 = vadd.f32 %v341_v60, %v312_v59 }
 0x11d   : > { %v383_v62 = vpop.f32.mrf.mxu0 }
 0x11e   : > { %v384_v63 = vadd.f32 %v383_v62, %v342_v61 }
 0x120   : > { %v412_v1 = vadd.f32 %v411_v0, %v384_v63 }
 0x122   : > { %v414_v3 = vmul.f32 5.656854, %v412_v1 }
 0x124   : > { %v416_v4 = vadd.f32 %v415_v2, %v414_v3 }
 0x126   : > { %418 = vst.msk [vmem:[%s161_s6] sm:$0xff] %vm417_vm3, %v416_v4 }
 0x127   : > { %577 = shalt.err (!%p574_p3)
}
 0x128   : > { %508 = dma.vmem_to_hbm [thread:$0]  (%p674_p5), %s433_s7, 128, %s435_s8, %s420_s16  }
 0x129 PF: > { %p514_p4 = scmp.ge.s32.totalorder %s612_s15, 2  ;;  %s446_s25 = sand.u32 1, %s600_s12  }
 0x12a   : > { %s447_s26 = scalar_lea.sflag [#allocation3], %s446_s25 }
 0x12b   : > { %p511_p7 = pnand %p514_p4, %p678_p6 }
 0x12d   : > { %p512_p8 = pneg %p511_p7 }
 0x12f   : > { %595 = dma.done.wait (%p512_p8), %s447_s26, 128  }
 0x130   : > { %597 = vsyncadd (%p512_p8), %s447_s26, 4294967168  ;;  %p13_p9 = scmp.ge.s32.totalorder %s661_s18, 4   ;;  %s793_s12 = smov %s604_s13 }
 0x131   : > { %s794_s13 = smov %s608_s14  ;;  %s795_s14 = smov %s672_s21 }
 0x132   : > { %s796_s15 = smov %s661_s18  ;;  %15 = sbr.rel (!%p13_p9) target bundleno = 3 (0x3), region = 67 }
 0x137   :  { %453 = vsyncpa [#allocation3], 1 }
 0x138   :  { %455 = vsyncpa [#allocation3 + $0x1], 1 }

</bundles_post_ra>
